<compile_context>
chip_gen: v5e
topology: v5e:2x2
jax: 0.10.0
libtpu: 0.0.40
codegen_flags: <defaults>
</compile_context>

<pallas_src>
import functools

import jax
import jax.numpy as jnp
from jax import lax
from jax.experimental import pallas as pl
from jax.experimental.pallas import tpu as pltpu

BN_EPS = 1e-5
LANE = 128
SUBLANE = 16                     # bf16 sublane packing -> batch tiles rounded to 16 rows
VMEM_BUDGET = 44 << 20           # conservative working-set budget across v5e / v6e / v7x


def _round_up(n, m):
    return ((n + m - 1) // m) * m


def _pad2d(a, rows, cols):
    r, c = a.shape
    if (r, c) == (rows, cols):
        return a
    return jnp.pad(a, ((0, rows - r), (0, cols - c)))


def _vmem_bytes(tb, nb, ip, hp, op, x_bytes, with_cache):
    """Rough VMEM working-set estimate (weights double-buffered, f32 h temporaries)."""
    weights = 2 * 2 * (ip * hp + hp * op)            # bf16 W1/W2, 2 pipeline buffers each
    io_tiles = 2 * tb * ip * x_bytes + 2 * tb * op * 4
    intermediates = 2 * tb * hp * 4                  # live f32 h / h_act values
    rows = 8 * hp * 4 + 2 * op * 4
    cache = nb * tb * hp * 2 if with_cache else 0
    return weights + io_tiles + intermediates + rows + cache


# ----------------------------------------------------------------------------- kernels

def _single_tile_kernel(batch_size, needs_row_mask,
                        x_ref, w1_ref, gamma_ref, beta_ref, w2_ref, b2_ref, alpha_ref,
                        out_ref):
    """Fast path (whole batch in one tile): single GEMM1 + in-register BN stats."""
    # Linear-1 bias is provably cancelled by train-mode BN's batch-mean subtraction, so it
    # is omitted from the GEMM (zero-padded batch rows therefore contribute exact zeros).
    h = jnp.dot(x_ref[...].astype(jnp.bfloat16), w1_ref[...],
                preferred_element_type=jnp.float32)                    # [TB, HP] f32
    inv_n = 1.0 / batch_size
    mean = jnp.sum(h, axis=0, keepdims=True) * inv_n
    centered = h - mean
    if needs_row_mask:   # padded rows would contribute (-mean)^2 to the two-pass variance
        rows = lax.broadcasted_iota(jnp.int32, h.shape, 0)
        centered = jnp.where(rows < batch_size, centered, 0.0)
    var = jnp.sum(centered * centered, axis=0, keepdims=True) * inv_n  # torch two-pass form
    scale = gamma_ref[...] * lax.rsqrt(var + BN_EPS)
    shift = beta_ref[...] - scale * mean
    h_bn = h * scale + shift
    alpha = alpha_ref[0, 0]                                            # PReLU slope (SMEM)
    h_act = jnp.where(h_bn > 0, h_bn, alpha * h_bn)
    out = jnp.dot(h_act.astype(jnp.bfloat16), w2_ref[...],
                  preferred_element_type=jnp.float32)
    out_ref[...] = (out + b2_ref[...]).astype(out_ref.dtype)


def _two_phase_kernel(inv_batch, use_h_cache,
                      x_ref, w1_ref, gamma_ref, beta_ref, w2_ref, b2_ref, alpha_ref,
                      out_ref,
                      sum_ref, sumsq_ref, scale_ref, shift_ref, *cache):
    """Multi-tile path.  Phase 0: GEMM1 + BN batch-stat accumulation (+ bf16 h cache).
    Phase 1: fold BN into one FMA, PReLU, GEMM2.  Zero-padded batch rows contribute 0 to the
    bias-free sums, so dividing by the true batch size keeps BatchNorm1d semantics."""
    phase = pl.program_id(0)   # 0: accumulate stats, 1: normalize + project
    tile = pl.program_id(1)    # batch tile
    h_cache_ref = cache[0] if use_h_cache else None

    @pl.when(phase == 0)
    def _accumulate_stats():
        @pl.when(tile == 0)
        def _init():
            sum_ref[...] = jnp.zeros_like(sum_ref)
            sumsq_ref[...] = jnp.zeros_like(sumsq_ref)

        h = jnp.dot(x_ref[...].astype(jnp.bfloat16), w1_ref[...],
                    preferred_element_type=jnp.float32)                # [TB, HP] f32
        sum_ref[...] += jnp.sum(h, axis=0, keepdims=True)
        # TODO(synk): E[h^2]-mean^2 can cancel when |mean|>>std; a third pass over the cached
        # h with (h-mean)^2 would reproduce torch's two-pass variance exactly.
        sumsq_ref[...] += jnp.sum(h * h, axis=0, keepdims=True)
        if use_h_cache:
            h_cache_ref[tile] = h.astype(jnp.bfloat16)                 # phase 1 skips GEMM1
        # NOTE: no out_ref write here -- all phase-0 steps alias output block 0 (phase-aware
        # out index_map), which stays VMEM-resident and is only flushed after phase-1/tile-0
        # overwrites it.  This removes the full-output zero-writeback pass.

    @pl.when(phase == 1)
    def _apply():
        @pl.when(tile == 0)
        def _finalize_stats():
            mean = sum_ref[...] * inv_batch
            var = jnp.maximum(sumsq_ref[...] * inv_batch - mean * mean, 0.0)
            scale = gamma_ref[...] * lax.rsqrt(var + BN_EPS)
            scale_ref[...] = scale
            shift_ref[...] = beta_ref[...] - scale * mean

        if use_h_cache:
            h = h_cache_ref[tile].astype(jnp.float32)
        else:
            h = jnp.dot(x_ref[...].astype(jnp.bfloat16), w1_ref[...],
                        preferred_element_type=jnp.float32)
        h_bn = h * scale_ref[...] + shift_ref[...]
        alpha = alpha_ref[0, 0]                                        # PReLU slope (SMEM)
        h_act = jnp.where(h_bn > 0, h_bn, alpha * h_bn)
        out = jnp.dot(h_act.astype(jnp.bfloat16), w2_ref[...],
                      preferred_element_type=jnp.float32)
        out_ref[...] = (out + b2_ref[...]).astype(out_ref.dtype)


# ----------------------------------------------------------------------------- wrapper

def prepare_params(params):
    """Pad/cast the loop-invariant weights & affine params once (lane-dense, bf16 MXU ops)."""
    in_f, hid = params["w1"].shape
    out_f = params["w2"].shape[1]
    ip, hp, op = _round_up(in_f, LANE), _round_up(hid, LANE), _round_up(out_f, LANE)
    return dict(
        w1=_pad2d(params["w1"], ip, hp).astype(jnp.bfloat16),
        w2=_pad2d(params["w2"], hp, op).astype(jnp.bfloat16),
        gamma=_pad2d(params["gamma"], 1, hp).astype(jnp.float32),
        beta=_pad2d(params["beta"], 1, hp).astype(jnp.float32),
        b2=_pad2d(params["b2"], 1, op).astype(jnp.float32),
        alpha=params["alpha"].reshape(1, 1).astype(jnp.float32),       # SMEM scalar
    )


def mlp_predictor(x, params, *, tile_b=512, prepared=None, _force_h_cache=None):
    """x: [B, input_size] f32.  params: dict from init_params (raw, unpadded).
    Returns [B, output_size] f32.  Train-mode BatchNorm1d semantics only (b1 is folded away
    by the batch-mean subtraction -- do NOT reuse with eval-mode running stats)."""
    B, in_f = x.shape
    hid = params["w1"].shape[1]
    out_f = params["w2"].shape[1]
    if prepared is None:
        prepared = prepare_params(params)   # hoist this call out of hot loops in production

    IP, HP, OP = _round_up(in_f, LANE), _round_up(hid, LANE), _round_up(out_f, LANE)

    TB = min(_round_up(B, SUBLANE), _round_up(tile_b, SUBLANE))
    # Shrink the batch tile until the (weights + pipelined tile) working set fits the
    # cross-generation VMEM budget (v7x: 64 MiB physical per TC).
    while TB > 64 and _vmem_bytes(TB, 1, IP, HP, OP, 4, False) > VMEM_BUDGET:
        TB = max(64, _round_up(TB // 2, SUBLANE))
    BP = _round_up(B, TB)
    nb = BP // TB

    # x: skip the host pad+cast round trip when already tile/lane aligned (kernel casts to
    # bf16 on the VPU); otherwise materialize a bf16 zero-padded copy (half the f32 bytes).
    if B == BP and in_f == IP:
        x_in = x
    else:
        x_in = _pad2d(x, BP, IP).astype(jnp.bfloat16)
    x_bytes = x_in.dtype.itemsize

    cost = pl.CostEstimate(
        flops=2 * B * (in_f * hid + hid * out_f),
        transcendentals=hid,
        bytes_accessed=(B * in_f * 4 + in_f * hid * 2 + hid * out_f * 2
                        + (3 * hid + out_f) * 4 + B * out_f * 4),
    )

    w1, w2 = prepared["w1"], prepared["w2"]
    gamma, beta = prepared["gamma"], prepared["beta"]
    b2, alpha = prepared["b2"], prepared["alpha"]

    if nb == 1:
        # -------- single-pass fast path: one GEMM1, no phase machinery, no double x DMA.
        est = _vmem_bytes(TB, 1, IP, HP, OP, x_bytes, False)
        vmem_limit = int(min(max(2 * est + (4 << 20), 32 << 20), 56 << 20))
        const = lambda i: (0, 0)
        out_p = pl.pallas_call(
            functools.partial(_single_tile_kernel, B, BP != B),
            out_shape=jax.ShapeDtypeStruct((BP, OP), jnp.float32),
            grid=(1,),
            in_specs=[
                pl.BlockSpec((BP, IP), const),       # x
                pl.BlockSpec((IP, HP), const),       # W1
                pl.BlockSpec((1, HP), const),        # BN gamma
                pl.BlockSpec((1, HP), const),        # BN beta
                pl.BlockSpec((HP, OP), const),       # W2
                pl.BlockSpec((1, OP), const),        # b2
                pl.BlockSpec(memory_space=pltpu.MemorySpace.SMEM),   # PReLU alpha scalar
            ],
            out_specs=pl.BlockSpec((BP, OP), const),
            compiler_params=pltpu.CompilerParams(
                dimension_semantics=("arbitrary",),
                vmem_limit_bytes=vmem_limit),
            cost_estimate=cost,
        )(x_in, w1, gamma, beta, w2, b2, alpha)
        return out_p[:B, :out_f]

    # -------- multi-tile two-phase path (BN batch stats need a full pass before normalize).
    use_h_cache = _vmem_bytes(TB, nb, IP, HP, OP, x_bytes, True) <= VMEM_BUDGET
    if _force_h_cache is not None:
        use_h_cache = bool(_force_h_cache)
    est = _vmem_bytes(TB, nb, IP, HP, OP, x_bytes, use_h_cache)
    vmem_limit = int(min(max(2 * est + (4 << 20), 32 << 20), 56 << 20))

    const = lambda p, t: (0, 0)                      # weights/affine stay VMEM-resident
    if use_h_cache:
        # Phase 1 never reads x: pin its block index to the last phase-0 block -> zero re-DMA.
        x_map = lambda p, t: ((1 - p) * t + p * (nb - 1), 0)
    else:
        x_map = lambda p, t: (t, 0)
    out_map = lambda p, t: (p * t, 0)                # phase 0 aliases one never-written block

    scratch = [
        pltpu.VMEM((1, HP), jnp.float32),            # sum(h)
        pltpu.VMEM((1, HP), jnp.float32),            # sum(h*h)
        pltpu.VMEM((1, HP), jnp.float32),            # folded BN scale
        pltpu.VMEM((1, HP), jnp.float32),            # folded BN shift
    ]
    if use_h_cache:
        scratch.append(pltpu.VMEM((nb, TB, HP), jnp.bfloat16))   # cached h tiles

    out_p = pl.pallas_call(
        functools.partial(_two_phase_kernel, 1.0 / B, use_h_cache),
        out_shape=jax.ShapeDtypeStruct((BP, OP), jnp.float32),
        grid=(2, nb),
        in_specs=[
            pl.BlockSpec((TB, IP), x_map),           # x (batch-tiled, phase-aware)
            pl.BlockSpec((IP, HP), const),           # W1
            pl.BlockSpec((1, HP), const),            # BN gamma
            pl.BlockSpec((1, HP), const),            # BN beta
            pl.BlockSpec((HP, OP), const),           # W2
            pl.BlockSpec((1, OP), const),            # b2
            pl.BlockSpec(memory_space=pltpu.MemorySpace.SMEM),   # PReLU alpha scalar
        ],
        out_specs=pl.BlockSpec((TB, OP), out_map),
        scratch_shapes=scratch,
        compiler_params=pltpu.CompilerParams(
            # Phase axis is a sequential two-pass reduction; phase-0 tiles share one
            # accumulator, so the batch axis cannot be megacore-parallel in this fused form.
            dimension_semantics=("arbitrary", "arbitrary"),
            vmem_limit_bytes=vmem_limit),
        cost_estimate=cost,
    )(x_in, w1, gamma, beta, w2, b2, alpha)
    return out_p[:B, :out_f]


# ----------------------------------------------------------------------------- params / refs

def init_params(key, input_size, hidden_size, output_size):
    """Mimics nn.Linear.reset_parameters; BN affine randomized to exercise the code path."""
    k1, k2, k3, k4, k5, k6 = jax.random.split(key, 6)
    bound1 = 1.0 / (input_size ** 0.5)
    bound2 = 1.0 / (hidden_size ** 0.5)
    # Weights stored pre-transposed as [in, out] so the kernel does x @ W.
    w1 = jax.random.uniform(k1, (input_size, hidden_size), jnp.float32, -bound1, bound1)
    b1 = jax.random.uniform(k2, (1, hidden_size), jnp.float32, -bound1, bound1)
    w2 = jax.random.uniform(k3, (hidden_size, output_size), jnp.float32, -bound2, bound2)
    b2 = jax.random.uniform(k4, (1, output_size), jnp.float32, -bound2, bound2)
    gamma = jax.random.uniform(k5, (1, hidden_size), jnp.float32, 0.5, 1.5)
    beta = 0.1 * jax.random.normal(k6, (1, hidden_size), jnp.float32)
    alpha = jnp.full((1, 1), 0.25, jnp.float32)   # PReLU default slope
    return dict(w1=w1, b1=b1, w2=w2, b2=b2, gamma=gamma, beta=beta, alpha=alpha)


def reference_torch_semantics(x, p):
    """Faithful f32 math of the PyTorch module (train-mode BatchNorm1d, with b1)."""
    h = x @ p["w1"] + p["b1"]
    mean = jnp.mean(h, axis=0, keepdims=True)
    var = jnp.mean((h - mean) ** 2, axis=0, keepdims=True)
    h = p["gamma"] * (h - mean) / jnp.sqrt(var + BN_EPS) + p["beta"]
    h = jnp.where(h > 0, h, p["alpha"][0, 0] * h)
    return h @ p["w2"] + p["b2"]


def reference_kernel_math(x, p, *, two_pass_var, bf16_h):
    """Mirrors the kernel numerics (bf16 MXU operands, folded BN, b1 dropped)."""
    h = jnp.dot(x.astype(jnp.bfloat16), p["w1"].astype(jnp.bfloat16),
                preferred_element_type=jnp.float32)
    mean = jnp.mean(h, axis=0, keepdims=True)
    if two_pass_var:
        var = jnp.mean((h - mean) ** 2, axis=0, keepdims=True)
    else:
        var = jnp.maximum(jnp.mean(h * h, axis=0, keepdims=True) - mean * mean, 0.0)
    scale = p["gamma"] * lax.rsqrt(var + BN_EPS)
    shift = p["beta"] - scale * mean
    h_used = h.astype(jnp.bfloat16).astype(jnp.float32) if bf16_h else h
    hb = h_used * scale + shift
    hb = jnp.where(hb > 0, hb, p["alpha"][0, 0] * hb)
    out = jnp.dot(hb.astype(jnp.bfloat16), p["w2"].astype(jnp.bfloat16),
                  preferred_element_type=jnp.float32)
    return out + p["b2"]


if __name__ == "__main__":
    key = jax.random.PRNGKey(0)
    kx1, kp1, kx2, kp2 = jax.random.split(key, 4)

    # ---- case 1: single-tile fast path (small shapes consistent with the module) ----
    batch, input_size, hidden_size, output_size = 8, 16, 32, 16
    x1 = jax.random.normal(kx1, (batch, input_size), jnp.float32)
    params1 = init_params(kp1, input_size, hidden_size, output_size)
    prep1 = prepare_params(params1)   # loop-invariant pad/cast hoisted out of the call
    out1 = jax.block_until_ready(mlp_predictor(x1, params1, prepared=prep1))
    assert out1.shape == (batch, output_size)
    ref1 = reference_kernel_math(x1, params1, two_pass_var=True, bf16_h=False)
    e1 = float(jnp.max(jnp.abs(out1 - ref1)))
    assert jnp.allclose(out1, ref1, atol=2e-3, rtol=2e-3), f"fast-path kernel-math mismatch {e1}"
    ref1_t = reference_torch_semantics(x1, params1)
    e1t = float(jnp.max(jnp.abs(out1 - ref1_t)))
    assert jnp.allclose(out1, ref1_t, atol=5e-2, rtol=5e-2), f"fast-path torch mismatch {e1t}"

    # ---- case 2: multi-tile two-phase path with VMEM h-cache (tile_b forced small) ----
    batch2, in2, hid2, outf2 = 80, 24, 48, 20
    x2 = jax.random.normal(kx2, (batch2, in2), jnp.float32)
    params2 = init_params(kp2, in2, hid2, outf2)
    out2 = jax.block_until_ready(mlp_predictor(x2, params2, tile_b=32))
    assert out2.shape == (batch2, outf2)
    ref2 = reference_kernel_math(x2, params2, two_pass_var=False, bf16_h=True)
    e2 = float(jnp.max(jnp.abs(out2 - ref2)))
    assert jnp.allclose(out2, ref2, atol=1e-2, rtol=1e-2), f"cached-path kernel-math mismatch {e2}"
    ref2_t = reference_torch_semantics(x2, params2)
    e2t = float(jnp.max(jnp.abs(out2 - ref2_t)))
    assert jnp.allclose(out2, ref2_t, atol=1e-1, rtol=1e-1), f"cached-path torch mismatch {e2t}"

    # ---- case 3: multi-tile recompute fallback (h-cache disabled) ----
    out3 = jax.block_until_ready(mlp_predictor(x2, params2, tile_b=32, _force_h_cache=False))
    ref3 = reference_kernel_math(x2, params2, two_pass_var=False, bf16_h=False)
    e3 = float(jnp.max(jnp.abs(out3 - ref3)))
    assert jnp.allclose(out3, ref3, atol=1e-2, rtol=1e-2), f"fallback kernel-math mismatch {e3}"
    assert jnp.allclose(out3, ref2_t, atol=1e-1, rtol=1e-1), "fallback torch mismatch"

    print("KERNEL_OK")
</pallas_src>

<mosaic_0001>
module attributes {stable_mosaic.version = 11 : i64} {
  func.func @_single_tile_kernel(%arg0: i32, %arg1: memref<16x128xbf16, #tpu.memory_space<vmem>>, %arg2: memref<128x128xbf16, #tpu.memory_space<vmem>>, %arg3: memref<1x128xf32, #tpu.memory_space<vmem>>, %arg4: memref<1x128xf32, #tpu.memory_space<vmem>>, %arg5: memref<128x128xbf16, #tpu.memory_space<vmem>>, %arg6: memref<1x128xf32, #tpu.memory_space<vmem>>, %arg7: memref<1x1xf32, #tpu.memory_space<smem>>, %arg8: memref<16x128xf32, #tpu.memory_space<vmem>>) attributes {dimension_semantics = [#tpu.dimension_semantics<arbitrary>], iteration_bounds = array<i64: 1>, scalar_prefetch = 0 : i64, scratch_operands = 0 : i64, tpu.core_type = #tpu.core_type<tc>, window_params = [{pipeline_mode = #tpu.pipeline_mode<synchronous>, transform_indices = @transform_0, window_bounds = array<i64: 16, 128>}, {pipeline_mode = #tpu.pipeline_mode<synchronous>, transform_indices = @transform_1, window_bounds = array<i64: 128, 128>}, {pipeline_mode = #tpu.pipeline_mode<synchronous>, transform_indices = @transform_2, window_bounds = array<i64: 1, 128>}, {pipeline_mode = #tpu.pipeline_mode<synchronous>, transform_indices = @transform_3, window_bounds = array<i64: 1, 128>}, {pipeline_mode = #tpu.pipeline_mode<synchronous>, transform_indices = @transform_4, window_bounds = array<i64: 128, 128>}, {pipeline_mode = #tpu.pipeline_mode<synchronous>, transform_indices = @transform_5, window_bounds = array<i64: 1, 128>}, {transform_indices = @transform_6, window_bounds = array<i64: 1, 1>}, {pipeline_mode = #tpu.pipeline_mode<synchronous>, transform_indices = @transform_7, window_bounds = array<i64: 16, 128>}]} {
    %c0 = arith.constant 0 : index
    %c0_0 = arith.constant 0 : index
    %0 = vector.load %arg1[%c0, %c0_0] : memref<16x128xbf16, #tpu.memory_space<vmem>>, vector<16x128xbf16>
    %c0_1 = arith.constant 0 : index
    %c0_2 = arith.constant 0 : index
    %1 = vector.load %arg2[%c0_1, %c0_2] : memref<128x128xbf16, #tpu.memory_space<vmem>>, vector<128x128xbf16>
    %cst = arith.constant dense<0.000000e+00> : vector<16x128xf32>
    %2 = tpu.matmul %0, %1, %cst {dimension_numbers = #tpu.dot_dimension_numbers<[1], [0], [0], [1], [0, 0, 1, 1], [], []>} : vector<16x128xbf16>, vector<128x128xbf16>, vector<16x128xf32> -> vector<16x128xf32>
    %cst_3 = arith.constant dense<0.000000e+00> : vector<128xf32>
    %3 = vector.multi_reduction <add>, %2, %cst_3 [0] : vector<16x128xf32> to vector<128xf32>
    %4 = vector.shape_cast %3 : vector<128xf32> to vector<1x128xf32>
    %cst_4 = arith.constant 1.250000e-01 : f32
    %5 = vector.broadcast %cst_4 : f32 to vector<1x128xf32>
    %6 = arith.mulf %4, %5 : vector<1x128xf32>
    %7 = vector.broadcast %6 : vector<1x128xf32> to vector<16x128xf32>
    %8 = arith.subf %2, %7 : vector<16x128xf32>
    %9 = tpu.iota {dimensions = array<i32: 0>} : vector<16x128xi32>
    %c8_i32 = arith.constant 8 : i32
    %10 = vector.broadcast %c8_i32 : i32 to vector<16x128xi32>
    %11 = arith.cmpi slt, %9, %10 : vector<16x128xi32>
    %cst_5 = arith.constant 0.000000e+00 : f32
    %12 = vector.broadcast %cst_5 : f32 to vector<16x128xf32>
    %13 = arith.select %11, %8, %12 : vector<16x128xi1>, vector<16x128xf32>
    %14 = arith.mulf %13, %13 : vector<16x128xf32>
    %cst_6 = arith.constant dense<0.000000e+00> : vector<128xf32>
    %15 = vector.multi_reduction <add>, %14, %cst_6 [0] : vector<16x128xf32> to vector<128xf32>
    %16 = vector.shape_cast %15 : vector<128xf32> to vector<1x128xf32>
    %cst_7 = arith.constant 1.250000e-01 : f32
    %17 = vector.broadcast %cst_7 : f32 to vector<1x128xf32>
    %18 = arith.mulf %16, %17 : vector<1x128xf32>
    %c0_8 = arith.constant 0 : index
    %c0_9 = arith.constant 0 : index
    %19 = vector.load %arg3[%c0_8, %c0_9] : memref<1x128xf32, #tpu.memory_space<vmem>>, vector<1x128xf32>
    %cst_10 = arith.constant 9.99999974E-6 : f32
    %20 = vector.broadcast %cst_10 : f32 to vector<1x128xf32>
    %21 = arith.addf %18, %20 : vector<1x128xf32>
    %22 = math.rsqrt %21 : vector<1x128xf32>
    %23 = arith.mulf %19, %22 : vector<1x128xf32>
    %c0_11 = arith.constant 0 : index
    %c0_12 = arith.constant 0 : index
    %24 = vector.load %arg4[%c0_11, %c0_12] : memref<1x128xf32, #tpu.memory_space<vmem>>, vector<1x128xf32>
    %25 = arith.mulf %23, %6 : vector<1x128xf32>
    %26 = arith.subf %24, %25 : vector<1x128xf32>
    %27 = vector.broadcast %23 : vector<1x128xf32> to vector<16x128xf32>
    %28 = arith.mulf %2, %27 : vector<16x128xf32>
    %29 = vector.broadcast %26 : vector<1x128xf32> to vector<16x128xf32>
    %30 = arith.addf %28, %29 : vector<16x128xf32>
    %c0_13 = arith.constant 0 : index
    %c0_14 = arith.constant 0 : index
    %31 = memref.load %arg7[%c0_13, %c0_14] : memref<1x1xf32, #tpu.memory_space<smem>>
    %cst_15 = arith.constant 0.000000e+00 : f32
    %32 = vector.broadcast %cst_15 : f32 to vector<16x128xf32>
    %33 = arith.cmpf ogt, %30, %32 : vector<16x128xf32>
    %34 = vector.broadcast %31 : f32 to vector<16x128xf32>
    %35 = arith.mulf %34, %30 : vector<16x128xf32>
    %36 = arith.select %33, %30, %35 : vector<16x128xi1>, vector<16x128xf32>
    %37 = arith.truncf %36 : vector<16x128xf32> to vector<16x128xbf16>
    %c0_16 = arith.constant 0 : index
    %c0_17 = arith.constant 0 : index
    %38 = vector.load %arg5[%c0_16, %c0_17] : memref<128x128xbf16, #tpu.memory_space<vmem>>, vector<128x128xbf16>
    %cst_18 = arith.constant dense<0.000000e+00> : vector<16x128xf32>
    %39 = tpu.matmul %37, %38, %cst_18 {dimension_numbers = #tpu.dot_dimension_numbers<[1], [0], [0], [1], [0, 0, 1, 1], [], []>} : vector<16x128xbf16>, vector<128x128xbf16>, vector<16x128xf32> -> vector<16x128xf32>
    %c0_19 = arith.constant 0 : index
    %c0_20 = arith.constant 0 : index
    %40 = vector.load %arg6[%c0_19, %c0_20] : memref<1x128xf32, #tpu.memory_space<vmem>>, vector<1x128xf32>
    %41 = vector.broadcast %40 : vector<1x128xf32> to vector<16x128xf32>
    %42 = arith.addf %39, %41 : vector<16x128xf32>
    %c0_21 = arith.constant 0 : index
    %c0_22 = arith.constant 0 : index
    %43 = vector.load %arg8[%c0_21, %c0_22] : memref<16x128xf32, #tpu.memory_space<vmem>>, vector<16x128xf32>
    tpu.vector_store %arg8[%c0_21, %c0_22], %42 {strides = array<i32>} : memref<16x128xf32, #tpu.memory_space<vmem>>, vector<16x128xf32>,
    return
  }
  func.func @transform_0(%arg0: i32) -> (i32, i32) {
    %c0_i32 = arith.constant 0 : i32
    %c0_i32_0 = arith.constant 0 : i32
    %c0_i32_1 = arith.constant 0 : i32
    return %c0_i32, %c0_i32_0 : i32, i32
  }
  func.func @transform_1(%arg0: i32) -> (i32, i32) {
    %c0_i32 = arith.constant 0 : i32
    %c0_i32_0 = arith.constant 0 : i32
    %c0_i32_1 = arith.constant 0 : i32
    return %c0_i32, %c0_i32_0 : i32, i32
  }
  func.func @transform_2(%arg0: i32) -> (i32, i32) {
    %c0_i32 = arith.constant 0 : i32
    %c0_i32_0 = arith.constant 0 : i32
    %c0_i32_1 = arith.constant 0 : i32
    return %c0_i32, %c0_i32_0 : i32, i32
  }
  func.func @transform_3(%arg0: i32) -> (i32, i32) {
    %c0_i32 = arith.constant 0 : i32
    %c0_i32_0 = arith.constant 0 : i32
    %c0_i32_1 = arith.constant 0 : i32
    return %c0_i32, %c0_i32_0 : i32, i32
  }
  func.func @transform_4(%arg0: i32) -> (i32, i32) {
    %c0_i32 = arith.constant 0 : i32
    %c0_i32_0 = arith.constant 0 : i32
    %c0_i32_1 = arith.constant 0 : i32
    return %c0_i32, %c0_i32_0 : i32, i32
  }
  func.func @transform_5(%arg0: i32) -> (i32, i32) {
    %c0_i32 = arith.constant 0 : i32
    %c0_i32_0 = arith.constant 0 : i32
    %c0_i32_1 = arith.constant 0 : i32
    return %c0_i32, %c0_i32_0 : i32, i32
  }
  func.func @transform_6(%arg0: i32) -> (i32, i32) {
    %c0_i32 = arith.constant 0 : i32
    %c0_i32_0 = arith.constant 0 : i32
    %c0_i32_1 = arith.constant 0 : i32
    return %c0_i32, %c0_i32_0 : i32, i32
  }
  func.func @transform_7(%arg0: i32) -> (i32, i32) {
    %c0_i32 = arith.constant 0 : i32
    %c0_i32_0 = arith.constant 0 : i32
    %c0_i32_1 = arith.constant 0 : i32
    return %c0_i32, %c0_i32_0 : i32, i32
  }
}

</mosaic_0001>

<bundles_post_ra>
// kernel: tpu_custom_call.1
= control target key start
LH: loop header
LB: loop body
LE: loop exit
PB: predicated region body
PF: predicated region fallthrough
CT: control target
= control target key end

     0   :  { %13 = vsyncpa [#allocation4], 0  ;;  %s597_s0 = inlined_call_operand.hbm [shape: bf16[16,128], index: 0, kind: input, shape index: {}]   ;;  %s598_s1 = inlined_call_operand.hbm [shape: bf16[128,128], index: 1, kind: input, shape index: {}]   ;;  %s599_s2 = inlined_call_operand.vmem [shape: f32[1,128], index: 2, kind: input, shape index: {}]   ;;  %s600_s3 = inlined_call_operand.vmem [shape: f32[1,128], index: 3, kind: input, shape index: {}]   ;;  %s601_s4 = inlined_call_operand.hbm [shape: bf16[128,128], index: 4, kind: input, shape index: {}]   ;;  %s602_s5 = inlined_call_operand.vmem [shape: f32[1,128], index: 5, kind: input, shape index: {}]   ;;  %s603_s6 = inlined_call_operand.<no memory space> [shape: f32[1,1], index: 6, kind: input, shape index: {}]   ;;  %s604_s7 = inlined_call_operand.hbm [shape: f32[16,128], index: 7, kind: output, shape index: {}]  }
   0x1   :  { %14 = vsyncpa [#allocation7], 0 }
   0x2   :  { %15 = vsyncpa [#allocation5], 0  ;;  %s33_s26 = sshll.u32 %s598_s1, 4  ;;  %s525_s27 = smov [#allocation6]   ;;  %s34_s26 = int_to_ptr.hbm [resolvable:$true] %s33_s26 }
   0x3   :  { %s35_s28 = sshll.u32 %s525_s27, 4  ;;  %s20_s8 = sshll.u32 %s597_s0, 4  ;;  %s36_s28 = int_to_ptr.vmem [resolvable:$true] %s35_s28  ;;  %s21_s8 = int_to_ptr.hbm [resolvable:$true] %s20_s8 }
   0x4   :  { %s526_s9 = smov 64   ;;  %s527_s10 = smov 4  }
   0x5   :  { %41 = dma.hbm_to_vmem [thread:$0]  %s34_s26, 1024, %s36_s28, [#allocation7], %s526_s9, %s526_s9, %s527_s10  }
   0x6   :  { %s528_s11 = smov [#allocation3]   ;;  %s50_s15 = sshll.u32 %s601_s4, 4  ;;  %s51_s15 = int_to_ptr.hbm [resolvable:$true] %s50_s15 }
   0x7   :  { %s22_s12 = sshll.u32 %s528_s11, 4  ;;  %s529_s1 = smov [#allocation8]   ;;  %s23_s12 = int_to_ptr.vmem [resolvable:$true] %s22_s12 }
   0x8   :  { %28 = dma.hbm_to_vmem [thread:$0]  %s21_s8, 128, %s23_s12, [#allocation4], %s526_s9, %s526_s9, %s527_s10  }
   0x9   :  { %s52_s16 = sshll.u32 %s529_s1, 4  ;;  %s53_s16 = int_to_ptr.vmem [resolvable:$true] %s52_s16 }
   0xa   :  { %58 = dma.hbm_to_vmem [thread:$0]  %s51_s15, 1024, %s53_s16, [#allocation7], %s526_s9, %s526_s9, %s527_s10  }
   0xb   :  { %519 = dma.done.wait [#allocation4], 128  }
   0xc   :  { %520 = vsyncadd [#allocation4], 4294967168 }
   0xd   :  { %521 = dma.done.wait [#allocation7], 2048  }
   0xe   :  { %522 = vsyncadd [#allocation7], 4294965248  ;;  %v403_v0 = vld [vmem:[#allocation6 + $0x38] sm:$0xff]  ;;  %v402_v1 = vld [vmem:[#allocation6 + $0x30] sm:$0xff]  ;;  %v217_v53 = vstv %s603_s6  ;;  %s530_s21 = smov [#allocation9]   ;;  %s313_s24 = sshll.u32 %s604_s7, 4  ;;  %s314_s24 = int_to_ptr.hbm [resolvable:$true] %s313_s24 }
   0xf   :  { %147 = vmatpush.bf16.msra.mxu0 %v403_v0  ;;  %v401_v2 = vld [vmem:[#allocation6 + $0x28] sm:$0xff]  ;;  %v400_v3 = vld [vmem:[#allocation6 + $0x20] sm:$0xff]  ;;  %v399_v4 = vld [vmem:[#allocation6 + $0x18] sm:$0xff]  ;;  %s311_s22 = sshll.u32 %s530_s21, 4  ;;  %s531_s25 = smov 128   ;;  %s312_s22 = int_to_ptr.vmem [resolvable:$true] %s311_s22 }
  0x10   :  { %v398_v5 = vld [vmem:[#allocation6 + $0x10] sm:$0xff]  ;;  %v397_v6 = vld [vmem:[#allocation6 + $0x8] sm:$0xff]  ;;  %v396_v7 = vld [vmem:[#allocation6] sm:$0xff]  ;;  %s532_s26 = smov 8  }
  0x11   :  { %v395_v8 = vld [vmem:[#allocation3] sm:$0xff]  ;;  %v410_v17 = vld [vmem:[#allocation8 + $0x30] sm:$0xff]  ;;  %v409_v20 = vld [vmem:[#allocation8 + $0x28] sm:$0xff] }
  0x12   :  { %v411_v14 = vld [vmem:[#allocation8 + $0x38] sm:$0xff]  ;;  %v408_v23 = vld [vmem:[#allocation8 + $0x20] sm:$0xff]  ;;  %v406_v29 = vld [vmem:[#allocation8 + $0x10] sm:$0xff] }
  0x13   :  { %148 = vmatpush.bf16.msra.mxu0 %v402_v1  ;;  %291 = vmatpush.bf16.msra.mxu1 %v411_v14  ;;  %v407_v26 = vld [vmem:[#allocation8 + $0x18] sm:$0xff]  ;;  %v405_v32 = vld [vmem:[#allocation8 + $0x8] sm:$0xff]  ;;  %v404_v34 = vld [vmem:[#allocation8] sm:$0xff] }
  0x14   :  { %v188_v42 = vld [vmem:[%s599_s2] sm:$0x1] }
  0x15   :  { %v201_v46 = vld [vmem:[%s600_s3] sm:$0x1] }
  0x16   :  { %v420_v61 = vld [vmem:[%s602_s5] ss:$0 sm:$0xff] }
  0x17   :  { %149 = vmatpush.bf16.msra.mxu0 %v401_v2  ;;  %292 = vmatpush.bf16.msra.mxu1 %v410_v17 }
  0x1b   :  { %150 = vmatpush.bf16.msra.mxu0 %v400_v3  ;;  %293 = vmatpush.bf16.msra.mxu1 %v409_v20 }
  0x1f   :  { %151 = vmatpush.bf16.msra.mxu0 %v399_v4  ;;  %294 = vmatpush.bf16.msra.mxu1 %v408_v23 }
  0x23   :  { %152 = vmatpush.bf16.msra.mxu0 %v398_v5  ;;  %295 = vmatpush.bf16.msra.mxu1 %v407_v26 }
  0x27   :  { %153 = vmatpush.bf16.msra.mxu0 %v397_v6  ;;  %296 = vmatpush.bf16.msra.mxu1 %v406_v29 }
  0x2b   :  { %154 = vmatpush.bf16.msra.mxu0 %v396_v7  ;;  %297 = vmatpush.bf16.msra.mxu1 %v405_v32 }
  0x2e   :  { %155 = vmatmul.bf16.vlgmr.msra.gmra.mxu0 %v395_v8 }
  0x2f   :  { %298 = vmatpush.bf16.msra.mxu1 %v404_v34 }
  0xab   :  { %v156_v9 = vpop.f32.mrf.mxu0 }
  0xb3   :  { %v158_v10 = vpop.f32.mrf.mxu0 }
  0xb4   :  { %v161_v11 = vadd.f32 %v158_v10, %v156_v9 }
  0xb6   :  { %v162_v12 = vrot.slane %v161_v11, 4 }
  0xb8   :  { %v163_v13 = vadd.f32 %v162_v12, %v161_v11 }
  0xba   :  { %v164_v15 = vrot.slane %v163_v13, 2 }
  0xbc   :  { %v165_v16 = vadd.f32 %v164_v15, %v163_v13 }
  0xbe   :  { %v166_v18 = vrot.slane %v165_v16, 1 }
  0xc0   :  { %v167_v19 = vadd.f32 %v166_v18, %v165_v16 }
  0xc2   :  { %v168_v21 = vmul.f32 0.125, %v167_v19 }
  0xc4   :  { %v169_v22 = vsub.f32 %v156_v9, %v168_v21 }
  0xc6   :  { %v178_v24 = vmul.f32 %v169_v22, %v169_v22 }
  0xc8   :  { %v181_v25 = vrot.slane %v178_v24, 4 }
  0xca   :  { %v182_v27 = vadd.f32 %v181_v25, %v178_v24 }
  0xcc   :  { %v183_v28 = vrot.slane %v182_v27, 2 }
  0xce   :  { %v184_v30 = vadd.f32 %v183_v28, %v182_v27 }
  0xd0   :  { %v185_v31 = vrot.slane %v184_v30, 1 }
  0xd2   :  { %v186_v33 = vadd.f32 %v185_v31, %v184_v30 }
  0xd4   :  { %v187_v35 = vmul.f32 0.125, %v186_v33 }
  0xd6   :  { %v189_v36 = vadd.f32 1e-05, %v187_v35 }
  0xd8   :  { %421 = vrsqrt.f32 %v189_v36  ;;  %vm196_vm1 = vweird.f32 %v189_v36 }
  0xde   :  { %v422_v37 = vpop.eup %421 }
  0xdf   :  { %v191_v38 = vmul.f32 %v422_v37, %v189_v36  ;;  %vm197_vm0 = vweird.f32 %v422_v37 }
  0xe0   :  { %vm198_vm2 = vmor %vm196_vm1, %vm197_vm0 }
  0xe1   :  { %v192_v39 = vmul.f32 %v422_v37, %v191_v38 }
  0xe3   :  { %v193_v40 = vmul.f32 0.5, %v192_v39 }
  0xe5   :  { %v194_v41 = vsub.f32 1.5, %v193_v40 }
  0xe7   :  { %v195_v43 = vmul.f32 %v422_v37, %v194_v41 }
  0xe9   :  { %v199_v44 = vsel %vm198_vm2, %v422_v37, %v195_v43 }
  0xea   :  { %v200_v45 = vmul.f32 %v199_v44, %v188_v42 }
  0xec   :  { %v202_v47 = vmul.f32 %v200_v45, %v168_v21  ;;  %v205_v48 = vperm.slane %v200_v45, 0 }
  0xee   :  { %v203_v49 = vsub.f32 %v201_v46, %v202_v47  ;;  %v207_v50 = vmul.f32 %v205_v48, %v156_v9  ;;  %v208_v51 = vmul.f32 %v205_v48, %v158_v10 }
  0xf0   :  { %v210_v52 = vperm.slane %v203_v49, 0 }
  0xf2   :  { %v212_v54 = vadd.f32 %v210_v52, %v207_v50  ;;  %v213_v55 = vadd.f32 %v210_v52, %v208_v51 }
  0xf4   :  { %vm215_vm3 = vcmp.gt.f32.partialorder %v212_v54, 0.0  ;;  %vm216_vm4 = vcmp.gt.f32.partialorder %v213_v55, 0.0  ;;  %v218_v56 = vmul.f32 %v217_v53, %v212_v54  ;;  %v219_v57 = vmul.f32 %v217_v53, %v213_v55 }
  0xf6   :  { %v220_v58 = vsel %vm215_vm3, %v212_v54, %v218_v56  ;;  %v221_v59 = vsel %vm216_vm4, %v213_v55, %v219_v57 }
  0xf7   :  { %v222_v60 = vpack.c.bf16 %v221_v59, %v220_v58 }
  0xf9   :  { %299 = vmatmul.bf16.vlgmr.msra.gmra.mxu1 %v222_v60 }
 0x176   :  { %v300_v62 = vpop.f32.mrf.mxu1 }
 0x177   :  { %v301_v63 = vadd.f32 %v420_v61, %v300_v62 }
 0x179   :  { %305 = vst [vmem:[#allocation9] sm:$0xff] %v301_v63 }
 0x17e   :  { %v302_v0 = vpop.f32.mrf.mxu1 }
 0x17f   :  { %v303_v1 = vadd.f32 %v420_v61, %v302_v0 }
 0x181   :  { %306 = vst [vmem:[#allocation9 + $0x8] sm:$0xff] %v303_v1 }
 0x182   :  { %319 = dma.vmem_to_hbm [thread:$0]  %s312_s22, 256, %s314_s24, [#allocation5], %s531_s25, %s531_s25, %s532_s26  }
 0x183   :  { %523 = dma.done.wait [#allocation5], 256  }
 0x184   :  { %524 = vsyncadd [#allocation5], 4294967040 }
 0x185   :  { %324 = vsyncpa [#allocation4], 1 }
 0x186   :  { %325 = vsyncpa [#allocation7], 1 }
 0x187   :  { %326 = vsyncpa [#allocation5], 1 }

</bundles_post_ra>
